<compile_context>
chip_gen: v7x
topology: tpu7x:2x2x1
jax: 0.10.0
libtpu: 0.0.40
codegen_flags: <defaults>
</compile_context>

<pallas_src>
import functools
import math

import jax
import jax.numpy as jnp
from jax import lax
from jax.experimental import pallas as pl
from jax.experimental.pallas import tpu as pltpu


_TARGET_GRID_STEPS = 8      # enough steps for pipelining + v7x's two TensorCores
_F32_TEMPS_PER_ELEM = 10    # ~live full-size f32 temporaries inside the body


@functools.lru_cache(maxsize=None)
def _vmem_budgets():
    """(vmem_limit_bytes, pipeline_budget_bytes) derived per TPU generation."""
    try:
        cap = int(pltpu.get_tpu_info().vmem_capacity_bytes)
    except Exception:
        cap = 0
    if cap <= 0:
        cap = 64 * 1024 * 1024                      # conservative: v7x per-TC VMEM
    limit = min((3 * cap) // 4, 96 * 1024 * 1024)   # ~96 MiB v5e/v6e, ~48 MiB v7x
    budget = (2 * limit) // 3                       # headroom for compiler scratch
    return limit, budget


@functools.lru_cache(maxsize=None)
def _supports_buffered():
    """One-time functional probe for pl.Buffered pipeline_mode.

    Narrow by construction: a failure here only disables the single-buffered
    weight / 3-deep input paths and can never mask errors from the real kernel.
    """
    try:
        def probe(a_ref, c_ref, o_ref):
            o_ref[...] = a_ref[...] + c_ref[...]

        x = (jnp.arange(32 * 128, dtype=jnp.float32) * 1e-3).reshape(32, 128)
        c = jnp.ones((8, 128), jnp.float32)
        out = pl.pallas_call(
            probe,
            out_shape=jax.ShapeDtypeStruct((32, 128), jnp.float32),
            grid_spec=pltpu.PrefetchScalarGridSpec(
                num_scalar_prefetch=0,
                grid=(4,),
                in_specs=[
                    pl.BlockSpec((8, 128), lambda i: (i, 0),
                                 pipeline_mode=pl.Buffered(3)),
                    pl.BlockSpec((8, 128), lambda i: (0, 0),
                                 pipeline_mode=pl.Buffered(1)),
                ],
                out_specs=pl.BlockSpec((8, 128), lambda i: (i, 0)),
            ),
        )(x, c)
        out = jax.block_until_ready(out)
        return bool(jnp.allclose(out, x + 1.0))
    except Exception:
        return False


def _patch_merge_kernel(x_ref, ga_ref, gb_ref, ba_ref, bb_ref, wa_ref, wb_ref,
                        o_ref, *, eps):
    """Fused 2x2-merge + LayerNorm(4C) + Linear(4C -> 2C) for one row tile.

    x_ref:   (TR, 2, WP, 2C)  plane 0 = [x0 | x2] channels, plane 1 = [x1 | x3]
    ga/gb:   (1, 2C)  LayerNorm gamma for plane-0 / plane-1 channel halves
    ba/bb:   (1, 2C)  LayerNorm beta  for plane-0 / plane-1 channel halves
    wa/wb:   (2C, 2C) reduction-weight rows for plane-0 / plane-1 halves
    o_ref:   (TR*WP, 2C)
    """
    tr, _, wq, c2 = x_ref.shape
    rows = tr * wq
    mxu_dtype = wa_ref.dtype

    # Slice the Ref (not a loaded value): the two planes are loaded directly,
    # without materializing the full 4-D tile first.
    xa = x_ref[:, 0, :, :].astype(jnp.float32)      # (TR, WP, 2C)
    xb = x_ref[:, 1, :, :].astype(jnp.float32)      # (TR, WP, 2C)

    # Two-pass mean / variance over the virtual 4C axis (f32; avoids the
    # E[x^2] - E[x]^2 cancellation of a one-pass estimator).
    inv_n = 1.0 / (2.0 * c2)
    mean = (jnp.sum(xa, axis=-1, keepdims=True)
            + jnp.sum(xb, axis=-1, keepdims=True)) * inv_n
    da = xa - mean
    db = xb - mean
    var = (jnp.sum(da * da, axis=-1, keepdims=True)
           + jnp.sum(db * db, axis=-1, keepdims=True)) * inv_n
    rstd = lax.rsqrt(var + eps)

    ga = ga_ref[...].astype(jnp.float32).reshape(1, 1, c2)
    gb = gb_ref[...].astype(jnp.float32).reshape(1, 1, c2)
    ba = ba_ref[...].astype(jnp.float32).reshape(1, 1, c2)
    bb = bb_ref[...].astype(jnp.float32).reshape(1, 1, c2)
    ya = da * rstd * ga + ba
    yb = db * rstd * gb + bb

    # Flatten to (rows, 2C) only AFTER the MXU-dtype cast, right before the
    # matmuls (halves any sublane relayout when WP % 8 != 0).
    ya = ya.astype(mxu_dtype).reshape(rows, c2)
    yb = yb.astype(mxu_dtype).reshape(rows, c2)
    out = jnp.dot(ya, wa_ref[...], preferred_element_type=jnp.float32)
    out = out + jnp.dot(yb, wb_ref[...], preferred_element_type=jnp.float32)
    o_ref[...] = out.astype(o_ref.dtype)


def _choose_row_tile(nr, wq, c2, in_item, out_item, resident_bytes, pipe_budget,
                     allow_deep_input):
    """Pick the first-axis row tile (each row = one merged-H row = WP out rows)."""
    # Output blocks are (tr*wq, 2C): keep the sublane dim a multiple of 8
    # unless a single block covers the whole array.
    align = 8 // math.gcd(wq, 8)

    budget = max(pipe_budget - resident_bytes, 1 << 20)

    def bytes_per_row(n_in_buf):
        return (n_in_buf * 2 * wq * c2 * in_item       # pipelined input buffers
                + 2 * wq * c2 * out_item               # double-buffered output
                + _F32_TEMPS_PER_ELEM * wq * c2 * 4)   # live f32 temporaries

    tr_vmem = max(1, budget // bytes_per_row(2))
    tr_steps = pl.cdiv(nr, _TARGET_GRID_STEPS)         # keep >= ~8 grid steps
    tr = max(1, min(nr, tr_vmem, tr_steps))
    if tr < nr:
        tr = min(nr, max(align, (tr // align) * align))

    # Deepen the input pipeline to 3 buffers when there is clear VMEM headroom
    # (short per-tile compute can otherwise expose input DMA latency on v7x).
    n_in_buf = 2
    if (allow_deep_input and tr < nr and pl.cdiv(nr, tr) >= 3
            and tr * bytes_per_row(3) <= budget):
        n_in_buf = 3
    return int(tr), n_in_buf


def _norm_reduce_pallas(x_r, ga, gb, ba, bb, wa, wb, *, eps):
    """x_r: (B*Hp, 2, Wp, 2C) -> (B*Hp*Wp, 2C)."""
    nr, _, wq, c2 = x_r.shape

    supports_pm = _supports_buffered()
    vmem_limit, pipe_budget = _vmem_budgets()

    const_copies = 1 if supports_pm else 2             # VMEM buffers per constant
    resident = const_copies * (2 * c2 * c2 * wa.dtype.itemsize
                               + 4 * c2 * ga.dtype.itemsize)

    tr, n_in_buf = _choose_row_tile(
        nr, wq, c2, x_r.dtype.itemsize, x_r.dtype.itemsize,
        resident, pipe_budget, supports_pm)

    const_kw = {"pipeline_mode": pl.Buffered(1)} if supports_pm else {}
    x_kw = ({"pipeline_mode": pl.Buffered(n_in_buf)}
            if (supports_pm and n_in_buf != 2) else {})

    in_specs = [
        pl.BlockSpec((tr, 2, wq, c2), lambda i: (i, 0, 0, 0), **x_kw),
        pl.BlockSpec((1, c2), lambda i: (0, 0), **const_kw),
        pl.BlockSpec((1, c2), lambda i: (0, 0), **const_kw),
        pl.BlockSpec((1, c2), lambda i: (0, 0), **const_kw),
        pl.BlockSpec((1, c2), lambda i: (0, 0), **const_kw),
        pl.BlockSpec((c2, c2), lambda i: (0, 0), **const_kw),
        pl.BlockSpec((c2, c2), lambda i: (0, 0), **const_kw),
    ]
    # 2D output: large 8-aligned sublane dim, dense stores; wrapper reshape is free.
    out_specs = pl.BlockSpec((tr * wq, c2), lambda i: (i, 0))

    fn = pl.pallas_call(
        functools.partial(_patch_merge_kernel, eps=eps),
        out_shape=jax.ShapeDtypeStruct((nr * wq, c2), x_r.dtype),
        grid_spec=pltpu.PrefetchScalarGridSpec(
            num_scalar_prefetch=0,
            grid=(pl.cdiv(nr, tr),),        # ragged last block: rows independent
            in_specs=in_specs,
            out_specs=out_specs,
        ),
        compiler_params=pltpu.CompilerParams(
            dimension_semantics=("parallel",),
            vmem_limit_bytes=vmem_limit,
        ),
    )
    return fn(x_r, ga, gb, ba, bb, wa, wb)


def patch_merging(x, gamma, beta, w, eps=1e-5, prefer_bf16_matmul=False):
    """PatchMerging forward.  x: (B, H, W, C) NHWC -> (B, ceil(H/2), ceil(W/2), 2C)."""
    b, h, w_dim, c = x.shape
    # padding(): pad H, W to even on the high side (no-op for even inputs).
    if (h % 2) or (w_dim % 2):
        x = jnp.pad(x, ((0, 0), (0, h % 2), (0, w_dim % 2), (0, 0)))
    hp, wp = (h + h % 2) // 2, (w_dim + w_dim % 2) // 2
    c2 = 2 * c

    # FREE reshape (no HBM movement): (B, 2Hp, 2Wp, C) -> (B*Hp, 2, Wp, 2C).
    # Plane p=0 carries [x0 | x2] channels, plane p=1 carries [x1 | x3].
    x_r = x.reshape(b * hp, 2, wp, c2)

    # Torch parameter order over 4C is [x0 | x1 | x2 | x3]; kernel order is
    # [x0 | x2] (plane 0) ++ [x1 | x3] (plane 1).  LayerNorm over 4C is
    # permutation invariant, so permute + split gamma/beta/W once at trace time.
    idx_a = jnp.concatenate([jnp.arange(0, c), jnp.arange(2 * c, 3 * c)])
    idx_b = jnp.concatenate([jnp.arange(c, 2 * c), jnp.arange(3 * c, 4 * c)])

    if x.dtype == jnp.bfloat16 and w.dtype == jnp.bfloat16:
        mxu_dtype = jnp.bfloat16
    elif prefer_bf16_matmul:
        # Opt-in bf16 MXU path for f32 inputs (4-8x matmul throughput, half the
        # W DMA); off by default to keep strict f32 reference accuracy.
        mxu_dtype = jnp.bfloat16
    else:
        mxu_dtype = jnp.float32

    ga, gb = gamma[idx_a].reshape(1, c2), gamma[idx_b].reshape(1, c2)
    ba, bb = beta[idx_a].reshape(1, c2), beta[idx_b].reshape(1, c2)
    wa = w[idx_a, :].astype(mxu_dtype)   # cast ONCE in the wrapper, not per step
    wb = w[idx_b, :].astype(mxu_dtype)

    out2d = _norm_reduce_pallas(x_r, ga, gb, ba, bb, wa, wb, eps=eps)
    return out2d.reshape(b, hp, wp, c2)


def _reference(x, gamma, beta, w, eps=1e-5):
    b, h, w_dim, c = x.shape
    x = jnp.pad(x, ((0, 0), (0, h % 2), (0, w_dim % 2), (0, 0)))
    x0 = x[:, 0::2, 0::2, :]
    x1 = x[:, 1::2, 0::2, :]
    x2 = x[:, 0::2, 1::2, :]
    x3 = x[:, 1::2, 1::2, :]
    xm = jnp.concatenate([x0, x1, x2, x3], axis=-1).astype(jnp.float32)
    mean = jnp.mean(xm, axis=-1, keepdims=True)
    var = jnp.mean((xm - mean) ** 2, axis=-1, keepdims=True)
    xn = (xm - mean) / jnp.sqrt(var + eps)
    y = xn * gamma + beta
    return jnp.einsum("bhwk,kd->bhwd", y, w)


if __name__ == "__main__":
    key = jax.random.PRNGKey(0)
    k_x, k_g, k_b, k_w, k_x2 = jax.random.split(key, 5)

    # Case 1: even spatial dims (no padding), typical Swin-like toy shape.
    B, H, W, DIM = 2, 16, 16, 32
    x = jax.random.normal(k_x, (B, H, W, DIM), dtype=jnp.float32)
    gamma = 1.0 + 0.1 * jax.random.normal(k_g, (4 * DIM,), dtype=jnp.float32)
    beta = 0.1 * jax.random.normal(k_b, (4 * DIM,), dtype=jnp.float32)
    w_red = jax.random.normal(k_w, (4 * DIM, 2 * DIM), dtype=jnp.float32) * (
        1.0 / jnp.sqrt(4.0 * DIM))

    out = jax.block_until_ready(patch_merging(x, gamma, beta, w_red))
    ref = _reference(x, gamma, beta, w_red)
    assert out.shape == (B, H // 2, W // 2, 2 * DIM), out.shape
    assert jnp.allclose(out, ref, atol=1e-3, rtol=1e-3), float(
        jnp.max(jnp.abs(out - ref)))

    # Case 2: odd W (exercises the high-side padding) and a row count that
    # leaves a ragged last grid block (exercises the pl.cdiv grid path).
    B2, H2, W2, DIM2 = 1, 26, 15, 16
    x2 = jax.random.normal(k_x2, (B2, H2, W2, DIM2), dtype=jnp.float32)
    gamma2, beta2 = gamma[: 4 * DIM2], beta[: 4 * DIM2]
    w2 = w_red[: 4 * DIM2, : 2 * DIM2]
    out2 = jax.block_until_ready(patch_merging(x2, gamma2, beta2, w2))
    ref2 = _reference(x2, gamma2, beta2, w2)
    assert out2.shape == (B2, (H2 + 1) // 2, (W2 + 1) // 2, 2 * DIM2), out2.shape
    assert jnp.allclose(out2, ref2, atol=1e-3, rtol=1e-3), float(
        jnp.max(jnp.abs(out2 - ref2)))

    print("KERNEL_OK")
</pallas_src>

<mosaic_0001>
module attributes {stable_mosaic.version = 11 : i64} {
  func.func @_patch_merge_kernel(%arg0: i32, %arg1: memref<2x2x8x64xf32, #tpu.memory_space<vmem>>, %arg2: memref<1x64xf32, #tpu.memory_space<vmem>>, %arg3: memref<1x64xf32, #tpu.memory_space<vmem>>, %arg4: memref<1x64xf32, #tpu.memory_space<vmem>>, %arg5: memref<1x64xf32, #tpu.memory_space<vmem>>, %arg6: memref<64x64xf32, #tpu.memory_space<vmem>>, %arg7: memref<64x64xf32, #tpu.memory_space<vmem>>, %arg8: memref<16x64xf32, #tpu.memory_space<vmem>>) attributes {dimension_semantics = [#tpu.dimension_semantics<parallel>], iteration_bounds = array<i64: 8>, scalar_prefetch = 0 : i64, scratch_operands = 0 : i64, tpu.core_type = #tpu.core_type<tc>, window_params = [{transform_indices = @transform_0, window_bounds = array<i64: 2, 2, 8, 64>}, {pipeline_mode = #tpu.pipeline_mode<synchronous>, transform_indices = @transform_1, window_bounds = array<i64: 1, 64>}, {pipeline_mode = #tpu.pipeline_mode<synchronous>, transform_indices = @transform_2, window_bounds = array<i64: 1, 64>}, {pipeline_mode = #tpu.pipeline_mode<synchronous>, transform_indices = @transform_3, window_bounds = array<i64: 1, 64>}, {pipeline_mode = #tpu.pipeline_mode<synchronous>, transform_indices = @transform_4, window_bounds = array<i64: 1, 64>}, {pipeline_mode = #tpu.pipeline_mode<synchronous>, transform_indices = @transform_5, window_bounds = array<i64: 64, 64>}, {pipeline_mode = #tpu.pipeline_mode<synchronous>, transform_indices = @transform_6, window_bounds = array<i64: 64, 64>}, {transform_indices = @transform_7, window_bounds = array<i64: 16, 64>}]} {
    %c0 = arith.constant 0 : index
    %c0_0 = arith.constant 0 : index
    %c0_1 = arith.constant 0 : index
    %c0_2 = arith.constant 0 : index
    %0 = vector.load %arg1[%c0, %c0_0, %c0_1, %c0_2] : memref<2x2x8x64xf32, #tpu.memory_space<vmem>>, vector<2x1x8x64xf32>
    %1 = vector.shape_cast %0 : vector<2x1x8x64xf32> to vector<2x8x64xf32>
    %c0_3 = arith.constant 0 : index
    %c1 = arith.constant 1 : index
    %c0_4 = arith.constant 0 : index
    %c0_5 = arith.constant 0 : index
    %2 = vector.load %arg1[%c0_3, %c1, %c0_4, %c0_5] : memref<2x2x8x64xf32, #tpu.memory_space<vmem>>, vector<2x1x8x64xf32>
    %3 = vector.shape_cast %2 : vector<2x1x8x64xf32> to vector<2x8x64xf32>
    %cst = arith.constant dense<0.000000e+00> : vector<2x8xf32>
    %4 = vector.multi_reduction <add>, %1, %cst [2] : vector<2x8x64xf32> to vector<2x8xf32>
    %5 = vector.shape_cast %4 : vector<2x8xf32> to vector<2x8x1xf32>
    %cst_6 = arith.constant dense<0.000000e+00> : vector<2x8xf32>
    %6 = vector.multi_reduction <add>, %3, %cst_6 [2] : vector<2x8x64xf32> to vector<2x8xf32>
    %7 = vector.shape_cast %6 : vector<2x8xf32> to vector<2x8x1xf32>
    %8 = arith.addf %5, %7 : vector<2x8x1xf32>
    %cst_7 = arith.constant 7.812500e-03 : f32
    %9 = vector.broadcast %cst_7 : f32 to vector<2x8x1xf32>
    %10 = arith.mulf %8, %9 : vector<2x8x1xf32>
    %11 = vector.broadcast %10 : vector<2x8x1xf32> to vector<2x8x64xf32>
    %12 = arith.subf %1, %11 : vector<2x8x64xf32>
    %13 = vector.broadcast %10 : vector<2x8x1xf32> to vector<2x8x64xf32>
    %14 = arith.subf %3, %13 : vector<2x8x64xf32>
    %15 = arith.mulf %12, %12 : vector<2x8x64xf32>
    %cst_8 = arith.constant dense<0.000000e+00> : vector<2x8xf32>
    %16 = vector.multi_reduction <add>, %15, %cst_8 [2] : vector<2x8x64xf32> to vector<2x8xf32>
    %17 = vector.shape_cast %16 : vector<2x8xf32> to vector<2x8x1xf32>
    %18 = arith.mulf %14, %14 : vector<2x8x64xf32>
    %cst_9 = arith.constant dense<0.000000e+00> : vector<2x8xf32>
    %19 = vector.multi_reduction <add>, %18, %cst_9 [2] : vector<2x8x64xf32> to vector<2x8xf32>
    %20 = vector.shape_cast %19 : vector<2x8xf32> to vector<2x8x1xf32>
    %21 = arith.addf %17, %20 : vector<2x8x1xf32>
    %cst_10 = arith.constant 7.812500e-03 : f32
    %22 = vector.broadcast %cst_10 : f32 to vector<2x8x1xf32>
    %23 = arith.mulf %21, %22 : vector<2x8x1xf32>
    %cst_11 = arith.constant 9.99999974E-6 : f32
    %24 = vector.broadcast %cst_11 : f32 to vector<2x8x1xf32>
    %25 = arith.addf %23, %24 : vector<2x8x1xf32>
    %26 = math.rsqrt %25 : vector<2x8x1xf32>
    %c0_12 = arith.constant 0 : index
    %c0_13 = arith.constant 0 : index
    %27 = vector.load %arg2[%c0_12, %c0_13] : memref<1x64xf32, #tpu.memory_space<vmem>>, vector<1x64xf32>
    %28 = vector.shape_cast %27 : vector<1x64xf32> to vector<1x1x64xf32>
    %c0_14 = arith.constant 0 : index
    %c0_15 = arith.constant 0 : index
    %29 = vector.load %arg3[%c0_14, %c0_15] : memref<1x64xf32, #tpu.memory_space<vmem>>, vector<1x64xf32>
    %30 = vector.shape_cast %29 : vector<1x64xf32> to vector<1x1x64xf32>
    %c0_16 = arith.constant 0 : index
    %c0_17 = arith.constant 0 : index
    %31 = vector.load %arg4[%c0_16, %c0_17] : memref<1x64xf32, #tpu.memory_space<vmem>>, vector<1x64xf32>
    %32 = vector.shape_cast %31 : vector<1x64xf32> to vector<1x1x64xf32>
    %c0_18 = arith.constant 0 : index
    %c0_19 = arith.constant 0 : index
    %33 = vector.load %arg5[%c0_18, %c0_19] : memref<1x64xf32, #tpu.memory_space<vmem>>, vector<1x64xf32>
    %34 = vector.shape_cast %33 : vector<1x64xf32> to vector<1x1x64xf32>
    %35 = vector.broadcast %26 : vector<2x8x1xf32> to vector<2x8x64xf32>
    %36 = arith.mulf %12, %35 : vector<2x8x64xf32>
    %37 = vector.broadcast %28 : vector<1x1x64xf32> to vector<2x8x64xf32>
    %38 = arith.mulf %36, %37 : vector<2x8x64xf32>
    %39 = vector.broadcast %32 : vector<1x1x64xf32> to vector<2x8x64xf32>
    %40 = arith.addf %38, %39 : vector<2x8x64xf32>
    %41 = vector.broadcast %26 : vector<2x8x1xf32> to vector<2x8x64xf32>
    %42 = arith.mulf %14, %41 : vector<2x8x64xf32>
    %43 = vector.broadcast %30 : vector<1x1x64xf32> to vector<2x8x64xf32>
    %44 = arith.mulf %42, %43 : vector<2x8x64xf32>
    %45 = vector.broadcast %34 : vector<1x1x64xf32> to vector<2x8x64xf32>
    %46 = arith.addf %44, %45 : vector<2x8x64xf32>
    %47 = vector.shape_cast %40 : vector<2x8x64xf32> to vector<16x64xf32>
    %48 = vector.shape_cast %46 : vector<2x8x64xf32> to vector<16x64xf32>
    %c0_20 = arith.constant 0 : index
    %c0_21 = arith.constant 0 : index
    %49 = vector.load %arg6[%c0_20, %c0_21] : memref<64x64xf32, #tpu.memory_space<vmem>>, vector<64x64xf32>
    %cst_22 = arith.constant dense<0.000000e+00> : vector<16x64xf32>
    %50 = tpu.matmul %47, %49, %cst_22 {dimension_numbers = #tpu.dot_dimension_numbers<[1], [0], [0], [1], [0, 0, 1, 1], [], []>} : vector<16x64xf32>, vector<64x64xf32>, vector<16x64xf32> -> vector<16x64xf32>
    %c0_23 = arith.constant 0 : index
    %c0_24 = arith.constant 0 : index
    %51 = vector.load %arg7[%c0_23, %c0_24] : memref<64x64xf32, #tpu.memory_space<vmem>>, vector<64x64xf32>
    %cst_25 = arith.constant dense<0.000000e+00> : vector<16x64xf32>
    %52 = tpu.matmul %48, %51, %cst_25 {dimension_numbers = #tpu.dot_dimension_numbers<[1], [0], [0], [1], [0, 0, 1, 1], [], []>} : vector<16x64xf32>, vector<64x64xf32>, vector<16x64xf32> -> vector<16x64xf32>
    %53 = arith.addf %50, %52 : vector<16x64xf32>
    %c0_26 = arith.constant 0 : index
    %c0_27 = arith.constant 0 : index
    %54 = vector.load %arg8[%c0_26, %c0_27] : memref<16x64xf32, #tpu.memory_space<vmem>>, vector<16x64xf32>
    tpu.vector_store %arg8[%c0_26, %c0_27], %53 {strides = array<i32>} : memref<16x64xf32, #tpu.memory_space<vmem>>, vector<16x64xf32>,
    return
  }
  func.func @transform_0(%arg0: i32) -> (i32, i32, i32, i32) {
    %c0_i32 = arith.constant 0 : i32
    %c0_i32_0 = arith.constant 0 : i32
    %c0_i32_1 = arith.constant 0 : i32
    %c0_i32_2 = arith.constant 0 : i32
    return %arg0, %c0_i32, %c0_i32_0, %c0_i32_1 : i32, i32, i32, i32
  }
  func.func @transform_1(%arg0: i32) -> (i32, i32) {
    %c0_i32 = arith.constant 0 : i32
    %c0_i32_0 = arith.constant 0 : i32
    %c0_i32_1 = arith.constant 0 : i32
    return %c0_i32, %c0_i32_0 : i32, i32
  }
  func.func @transform_2(%arg0: i32) -> (i32, i32) {
    %c0_i32 = arith.constant 0 : i32
    %c0_i32_0 = arith.constant 0 : i32
    %c0_i32_1 = arith.constant 0 : i32
    return %c0_i32, %c0_i32_0 : i32, i32
  }
  func.func @transform_3(%arg0: i32) -> (i32, i32) {
    %c0_i32 = arith.constant 0 : i32
    %c0_i32_0 = arith.constant 0 : i32
    %c0_i32_1 = arith.constant 0 : i32
    return %c0_i32, %c0_i32_0 : i32, i32
  }
  func.func @transform_4(%arg0: i32) -> (i32, i32) {
    %c0_i32 = arith.constant 0 : i32
    %c0_i32_0 = arith.constant 0 : i32
    %c0_i32_1 = arith.constant 0 : i32
    return %c0_i32, %c0_i32_0 : i32, i32
  }
  func.func @transform_5(%arg0: i32) -> (i32, i32) {
    %c0_i32 = arith.constant 0 : i32
    %c0_i32_0 = arith.constant 0 : i32
    %c0_i32_1 = arith.constant 0 : i32
    return %c0_i32, %c0_i32_0 : i32, i32
  }
  func.func @transform_6(%arg0: i32) -> (i32, i32) {
    %c0_i32 = arith.constant 0 : i32
    %c0_i32_0 = arith.constant 0 : i32
    %c0_i32_1 = arith.constant 0 : i32
    return %c0_i32, %c0_i32_0 : i32, i32
  }
  func.func @transform_7(%arg0: i32) -> (i32, i32) {
    %c0_i32 = arith.constant 0 : i32
    %c0_i32_0 = arith.constant 0 : i32
    return %arg0, %c0_i32 : i32, i32
  }
}

</mosaic_0001>

<bundles_post_ra>
// kernel: tpu_custom_call.1
= control target key start
LH: loop header
LB: loop body
LE: loop exit
PB: predicated region body
PF: predicated region fallthrough
CT: control target
= control target key end

     0   :  { %12 = vsyncpa [#allocation3], 0  ;;  %s1279_s0 = inlined_call_operand.hbm [shape: f32[16,2,8,64], index: 0, kind: input, shape index: {}]   ;;  %s1280_s1 = inlined_call_operand.vmem [shape: f32[1,64], index: 1, kind: input, shape index: {}]   ;;  %s1281_s2 = inlined_call_operand.vmem [shape: f32[1,64], index: 2, kind: input, shape index: {}]   ;;  %s1282_s3 = inlined_call_operand.vmem [shape: f32[1,64], index: 3, kind: input, shape index: {}]   ;;  %s1283_s4 = inlined_call_operand.vmem [shape: f32[1,64], index: 4, kind: input, shape index: {}]   ;;  %s1284_s5 = inlined_call_operand.hbm [shape: f32[64,64], index: 5, kind: input, shape index: {}]   ;;  %s1285_s6 = inlined_call_operand.hbm [shape: f32[64,64], index: 6, kind: input, shape index: {}]   ;;  %s1286_s7 = inlined_call_operand.vmem [shape: f32[128,64], index: 7, kind: output, shape index: {}]  }
   0x1   :  { %14 = vsyncpa [#allocation3 + $0x1], 0 }
   0x2   :  { %15 = vsyncpa [#allocation5], 0  ;;  %s1046_s24 = smov 0   ;;  %s1048_s25 = smov 0  }
   0x3   :  { %s1050_s26 = smov 0   ;;  %s1052_s27 = smov 0  }
   0x4 LB: > { %s687_s28 = sadd.s32 4294967295, %s999_s27   ;;  %p41_p0 = scmp.ne.s32.totalorder %s991_s25, %s987_s24  ;;  %s999_s27 = sphi %s1052_s27, %s1299_s27   ;;  %s995_s26 = sphi %s1050_s26, %s1302_s26   ;;  %s991_s25 = sphi %s1048_s25, %s1301_s25   ;;  %s987_s24 = sphi %s1046_s24, %s1300_s24  }
   0x5   : > { %p1068_p1 = scmp.eq.s32.totalorder %s687_s28, 0  ;;  %p689_p2 = scmp.ge.s32.totalorder %s999_s27, 1 }
   0x6   : > { %p204_p3 = scmp.lt.s32.totalorder %s999_s27, 9  ;;  %s1001_s9 = smov [#allocation4]  }
   0x7   : > { %s1291_s29 = scalar_select %p1068_p1, 1, 0 }
   0x8   : > { %p1076_p4 = por %p1068_p1, %p41_p0  ;;  %p1080_p5 = pnand %p689_p2, %p204_p3 }
   0x9   : > { %s228_s10 = sshll.u32 %s1001_s9, 4  ;;  %s1002_s12 = smov [#allocation6]   ;;  %s229_s10 = int_to_ptr.vmem [resolvable:$true] %s228_s10 }
   0xa   : > { %s1292_s30 = scalar_select %p1076_p4, 1, 0 }
   0xb   : > { %s1293_s8 = scalar_select %p1080_p5, 1, 0 }
   0xc   : > { %p819_p6 = pneg %p1080_p5  ;;  %s241_s13 = sshll.u32 %s1002_s12, 4  ;;  %s1092_s13 = int_to_ptr.vmem [resolvable:$true] %s241_s13 }
   0xd   : > { %s875_s16 = scalar_lea.hbm %s1284_s5, 1024 }
   0xe   : > { %p1088_p7 = pnand %p819_p6, %p1068_p1  ;;  %p876_p8 = scmp.ne.s32.totalorder %s1284_s5, %s875_s16 }
   0xf   : > { %p882_p12 = scmp.lt.u32.totalorder %s875_s16, %s1284_s5 }
  0x10   : > { %p877_p9 = pneg %p1088_p7 }
  0x12   : > { %p878_p10 = pnand %p877_p9, %p876_p8 }
  0x14   : > { %p879_p11 = pneg %p878_p10 }
  0x16   : > { %p884_p13 = pnand %p882_p12, %p879_p11 }
  0x18   : > { %887 = shalt.err (!%p884_p13)
}
  0x19   : > { %s888_s21 = scalar_lea.vmem %s229_s10, 1024  ;;  %p896_p6 = scmp.lt.s32.totalorder %s229_s10, %s229_s10 }
  0x1a   : > { %p889_p0 = scmp.ne.s32.totalorder %s229_s10, %s888_s21  ;;  %p897_p1 = scmp.lt.s32.totalorder %s888_s21, %s888_s21 }
  0x1c   : > { %p891_p2 = pnand %p889_p0, %p877_p9  ;;  %p898_p4 = por %p897_p1, %p896_p6 }
  0x1e   : > { %p892_p3 = pneg %p891_p2 }
  0x20   : > { %p899_p5 = pnand %p898_p4, %p892_p3 }
  0x22   : > { %902 = shalt.err (!%p899_p5)
}
  0x23   : > { %s1003_s22 = smov 128   ;;  %s1004_s23 = smov 8  }
  0x24   : > { %822 = dma.hbm_to_vmem [thread:$0]  (!%p1088_p7), %s1284_s5, 1024, %s229_s10, [#allocation5], %s1003_s22, %s1003_s22, %s1004_s23  }
  0x25   : > { %s903_s15 = scalar_lea.hbm %s1285_s6, 1024 }
  0x26   : > { %p904_p1 = scmp.ne.s32.totalorder %s1285_s6, %s903_s15  ;;  %p910_p8 = scmp.lt.u32.totalorder %s903_s15, %s1285_s6 }
  0x28   : > { %p906_p4 = pnand %p904_p1, %p877_p9 }
  0x2a   : > { %p907_p5 = pneg %p906_p4 }
  0x2c   : > { %p912_p10 = pnand %p910_p8, %p907_p5 }
  0x2e   : > { %915 = shalt.err (!%p912_p10)
}
  0x2f   : > { %s916_s10 = scalar_lea.vmem %s1092_s13, 1024  ;;  %p924_p0 = scmp.lt.s32.totalorder %s1092_s13, %s1092_s13 }
  0x30   : > { %p917_p11 = scmp.ne.s32.totalorder %s1092_s13, %s916_s10  ;;  %p925_p2 = scmp.lt.s32.totalorder %s916_s10, %s916_s10 }
  0x32   : > { %p919_p12 = pnand %p917_p11, %p877_p9  ;;  %p926_p3 = por %p925_p2, %p924_p0 }
  0x34   : > { %p920_p13 = pneg %p919_p12 }
  0x36   : > { %p927_p6 = pnand %p926_p3, %p920_p13 }
  0x38   : > { %930 = shalt.err (!%p927_p6)
}
  0x39   : > { %825 = dma.hbm_to_vmem [thread:$0]  (!%p1088_p7), %s1285_s6, 1024, %s1092_s13, [#allocation5], %s1003_s22, %s1003_s22, %s1004_s23  }
  0x3a   : > { %s1148_s24 = sadd.s32 1, %s999_s27   ;;  %s28_s11 = sadd.s32 1, %s995_s26 }
  0x3b   : > { %s25_s9 = ssub.s32 %s999_s27, %s1148_s24  ;;  %p35_p9 = scmp.ne.s32.totalorder %s995_s26, %s991_s25 }
  0x3c   : > { %p26_p1 = scmp.eq.s32.totalorder %s25_s9, 0  ;;  %p36_p4 = scmp.eq.s32.totalorder %s999_s27, 0 }
  0x3d   : > { %p832_p5 = scmp.lt.s32.totalorder %s999_s27, 8  ;;  %s255_s12 = sand.u32 1, %s995_s26  }
  0x3e   : > { %s1159_s14 = scalar_select %p26_p1, %s995_s26, %s28_s11  }
  0x3f   : > { %p37_p8 = por %p36_p4, %p35_p9  ;;  %s693_s15 = sshll.u32 %s255_s12, 5 }
  0x40   : > { %s716_s16 = sshll.u32 %s999_s27, 9  ;;  %s259_s13 = scalar_lea.vmem [#allocation2], %s693_s15 }
  0x41   : > { %s1165_s19 = scalar_lea.hbm %s1279_s0, %s716_s16  ;;  %s267_s10 = sshll.u32 %s259_s13, 4  ;;  %s1171_s10 = int_to_ptr.vmem [resolvable:$true] %s267_s10 }
  0x42   : > { %p1167_p7 = pnand %p832_p5, %p37_p8  ;;  %s1173_s21 = scalar_lea.sflag [#allocation3], %s255_s12 }
  0x43   : > { %s931_s11 = scalar_lea.hbm %s1165_s19, 512  ;;  %s936_s16 = scalar_lea.hbm %s1279_s0, 4096 }
  0x44   : > { %p932_p10 = scmp.ne.s32.totalorder %s1165_s19, %s931_s11  ;;  %p933_p11 = pneg %p1167_p7 }
  0x45   : > { %p937_p0 = scmp.lt.u32.totalorder %s1165_s19, %s1279_s0  ;;  %p938_p2 = scmp.lt.u32.totalorder %s936_s16, %s931_s11 }
  0x46   : > { %p934_p12 = pnand %p933_p11, %p932_p10  ;;  %p940_p6 = scmp.lt.u32.totalorder %s931_s11, %s1165_s19 }
  0x47   : > { %p939_p3 = por %p938_p2, %p937_p0 }
  0x48   : > { %p935_p13 = pneg %p934_p12 }
  0x49   : > { %p941_p9 = por %p940_p6, %p939_p3 }
  0x4b   : > { %p942_p1 = pnand %p941_p9, %p935_p13 }
  0x4d   : > { %945 = shalt.err (!%p942_p1)
}
  0x4e   : > { %s946_s12 = scalar_lea.vmem %s1171_s10, 512  ;;  %s1005_s13 = smov [#allocation2]  }
  0x4f   : > { %p947_p4 = scmp.ne.s32.totalorder %s1171_s10, %s946_s12  ;;  %s951_s9 = sshll.u32 %s1005_s13, 4  ;;  %s952_s9 = int_to_ptr.vmem [resolvable:$false] %s951_s9 }
  0x50   : > { %s953_s15 = scalar_lea.vmem %s952_s9, 1024  ;;  %p954_p10 = scmp.lt.s32.totalorder %s1171_s10, %s952_s9 }
  0x51   : > { %p949_p5 = pnand %p947_p4, %p933_p11  ;;  %p955_p12 = scmp.lt.s32.totalorder %s953_s15, %s946_s12 }
  0x53   : > { %p950_p8 = pneg %p949_p5  ;;  %p956_p0 = por %p955_p12, %p954_p10 }
  0x55   : > { %p957_p2 = pnand %p956_p0, %p950_p8 }
  0x57   : > { %960 = shalt.err (!%p957_p2)
}
  0x58   : > { %829 = dma.hbm_to_vmem [thread:$0]  (!%p1167_p7), %s1165_s19, 512, %s1171_s10, %s1173_s21, %s1003_s22, %s1003_s22, %s1004_s23  }
  0x59   : > { %p1296_p11 = scmp.ne.s32.totalorder %s1293_s8, 0 }
  0x5a   : > { %s281_s11 = sand.u32 (!%p1296_p11), 1, %s991_s25   ;;  %p1297_p13 = scmp.ne.s32.totalorder (!%p1296_p11), %s1292_s30, 0 }
  0x5b   : > { %279 = sbr.rel (%p1296_p11) target bundleno = 644 (0x284), region = 48  ;;  %s698_s16 = sshll.u32 (!%p1296_p11), %s281_s11, 5 }
  0x5c   : > { %s282_s17 = scalar_lea.sflag (!%p1296_p11), [#allocation3], %s281_s11  ;;  %s285_s18 = scalar_lea.vmem (!%p1296_p11), [#allocation2], %s698_s16 }
  0x62   : > { %978 = dma.done.wait (%p1297_p13), %s282_s17, 512  }
  0x63   : > { %980 = vsyncadd (%p1297_p13), %s282_s17, 4294966784  ;;  %p1298_p3 = scmp.ne.s32.totalorder %s1291_s29, 0 }
  0x65   : > { %982 = dma.done.wait (%p1298_p3), [#allocation5], 2048  }
  0x66   : > { %984 = vsyncadd (%p1298_p3), [#allocation5], 4294965248  ;;  %vm336_vm0 = vcmask 523264   ;;  %v332_v0 = vld [vmem:[%s285_s18 + $0x10] sm:$0xff]  ;;  %v331_v1 = vld [vmem:[%s285_s18] sm:$0xff]  ;;  %s701_s21 = sshll.u32 %s687_s28, 1 }
  0x67   : > { %v704_v2 = vld [vmem:[%s285_s18 + $0x18] sm:$0xff]  ;;  %v340_v3 = vsel %vm336_vm0, %v332_v0, 0.0  ;;  %v337_v4 = vsel %vm336_vm0, %v331_v1, 0.0  ;;  %v703_v5 = vld [vmem:[%s285_s18 + $0x8] sm:$0xff]  ;;  %v429_v28 = vld [vmem:[#allocation6] sm:$0xff]  ;;  %p326_p7 = scmp.lt.s32.totalorder %s701_s21, 15 }
  0x68   : > { %341 = vadd.xlane.f32.xlu1 %v340_v3  ;;  %338 = vadd.xlane.f32.xlu0 %v337_v4  ;;  %v346_v6 = vsel %vm336_vm0, %v704_v2, 0.0  ;;  %v343_v7 = vsel %vm336_vm0, %v703_v5, 0.0  ;;  %v430_v29 = vld [vmem:[#allocation6 + $0x8] sm:$0xff]  ;;  %v421_v30 = vld [vmem:[#allocation4] sm:$0xff]  ;;  %v431_v34 = vld [vmem:[#allocation6 + $0x10] sm:$0xff] }
  0x69   : > { %v775_v31 = vpack.c.bf16 %v430_v29, %v429_v28  ;;  %v422_v32 = vld [vmem:[#allocation4 + $0x8] sm:$0xff]  ;;  %v432_v35 = vld [vmem:[#allocation6 + $0x18] sm:$0xff]  ;;  %v423_v36 = vld [vmem:[#allocation4 + $0x10] sm:$0xff]  ;;  %s1304_s21 = smov (!%p326_p7, %s701_s21), 15 }
  0x6a   : > { %v791_v33 = vpack.c.bf16 %v422_v32, %v421_v30  ;;  %v779_v37 = vpack.c.bf16 %v432_v35, %v431_v34  ;;  %v424_v38 = vld [vmem:[#allocation4 + $0x18] sm:$0xff]  ;;  %v433_v39 = vld [vmem:[#allocation6 + $0x20] sm:$0xff]  ;;  %v434_v40 = vld [vmem:[#allocation6 + $0x28] sm:$0xff]  ;;  %s702_s12 = sshll.u32 %s1304_s21, 3 }
  0x6b   : > { %776 = vmatprep.subr.bf16.mxu1 %v775_v31  ;;  %v795_v41 = vpack.c.bf16 %v424_v38, %v423_v36  ;;  %v425_v42 = vld [vmem:[#allocation4 + $0x20] sm:$0xff]  ;;  %v426_v43 = vld [vmem:[#allocation4 + $0x28] sm:$0xff]  ;;  %v783_v44 = vpack.c.bf16 %v434_v40, %v433_v39  ;;  %v435_v46 = vld [vmem:[#allocation6 + $0x30] sm:$0xff]  ;;  %s329_s15 = scalar_lea.vmem %s1286_s7, %s702_s12 }
  0x6c   : > { %347 = vadd.xlane.f32.xlu1 %v346_v6  ;;  %344 = vadd.xlane.f32.xlu0 %v343_v7  ;;  %v799_v45 = vpack.c.bf16 %v426_v43, %v425_v42  ;;  %v436_v47 = vld [vmem:[#allocation6 + $0x38] sm:$0xff]  ;;  %v427_v49 = vld [vmem:[#allocation4 + $0x30] sm:$0xff]  ;;  %v707_v63 = vld [vmem:[%s1281_s2] ss:$0 sm:$0xff] }
  0x6d   : > { %792 = vmatprep.subr.bf16.mxu0 %v791_v33  ;;  %778 = vmatpush3.bf16.msra.mxu1 %v775_v31  ;;  %v787_v48 = vpack.c.bf16 %v436_v47, %v435_v46  ;;  %v428_v50 = vld [vmem:[#allocation4 + $0x38] sm:$0xff]  ;;  %v708_v3 = vld [vmem:[%s1283_s4] ss:$0 sm:$0xff] }
  0x6e   : > { %794 = vmatpush3.bf16.msra.mxu0 %v791_v33  ;;  %780 = vmatprep.subr.bf16.mxu1 %v779_v37  ;;  %v803_v51 = vpack.c.bf16 %v428_v50, %v427_v49  ;;  %v706_v4 = vld [vmem:[%s1282_s3] ss:$0 sm:$0xff] }
  0x6f   : > { %796 = vmatprep.subr.bf16.mxu0 %v795_v41 }
  0x71   : > { %782 = vmatpush3.bf16.msra.mxu1 %v779_v37 }
  0x72   : > { %798 = vmatpush3.bf16.msra.mxu0 %v795_v41  ;;  %784 = vmatprep.subr.bf16.mxu1 %v783_v44 }
  0x73   : > { %800 = vmatprep.subr.bf16.mxu0 %v799_v45 }
  0x75   : > { %786 = vmatpush3.bf16.msra.mxu1 %v783_v44 }
  0x76   : > { %802 = vmatpush3.bf16.msra.mxu0 %v799_v45  ;;  %788 = vmatprep.subr.bf16.mxu1 %v787_v48 }
  0x77   : > { %804 = vmatprep.subr.bf16.mxu0 %v803_v51 }
  0x79   : > { %790 = vmatpush3.bf16.msra.mxu1 %v787_v48 }
  0x7a   : > { %806 = vmatpush3.bf16.msra.mxu0 %v803_v51 }
  0xf5   : > { %v342_v8 = vpop.xlane.xlu1 %341  ;;  %v339_v9 = vpop.xlane.xlu0 %338 }
  0xf9   : > { %v348_v10 = vpop.xlane.xlu1 %347  ;;  %v345_v11 = vpop.xlane.xlu0 %344 }
  0xfa   : > { %v350_v12 = vadd.f32 %v348_v10, %v342_v8  ;;  %v349_v13 = vadd.f32 %v345_v11, %v339_v9 }
  0xfc   : > { %v352_v14 = vmul.f32 0.0078125, %v350_v12  ;;  %v351_v15 = vmul.f32 0.0078125, %v349_v13 }
  0xfe   : > { %v1219_v16 = vsub.f32 %v332_v0, %v352_v14  ;;  %v1221_v17 = vsub.f32 %v704_v2, %v352_v14  ;;  %v1223_v18 = vsub.f32 %v331_v1, %v351_v15  ;;  %v1225_v19 = vsub.f32 %v703_v5, %v351_v15  ;;  %v705_v0 = vld [vmem:[%s1280_s1] ss:$0 sm:$0xff] }
 0x100   : > { %v365_v20 = vmul.f32 %v1225_v19, %v1225_v19  ;;  %v357_v21 = vmul.f32 %v1223_v18, %v1223_v18  ;;  %v366_v24 = vmul.f32 %v1221_v17, %v1221_v17  ;;  %v358_v25 = vmul.f32 %v1219_v16, %v1219_v16 }
 0x102   : > { %v367_v22 = vsel %vm336_vm0, %v365_v20, 0.0  ;;  %v359_v23 = vsel %vm336_vm0, %v357_v21, 0.0  ;;  %v370_v26 = vsel %vm336_vm0, %v366_v24, 0.0  ;;  %v362_v27 = vsel %vm336_vm0, %v358_v25, 0.0 }
 0x103   : > { %368 = vadd.xlane.f32.xlu1 %v367_v22  ;;  %360 = vadd.xlane.f32.xlu0 %v359_v23 }
 0x107   : > { %371 = vadd.xlane.f32.xlu1 %v370_v26  ;;  %363 = vadd.xlane.f32.xlu0 %v362_v27 }
 0x190   : > { %v369_v52 = vpop.xlane.xlu1 %368  ;;  %v361_v53 = vpop.xlane.xlu0 %360 }
 0x191   : > { %v373_v54 = vadd.f32 %v369_v52, %v361_v53 }
 0x193   : > { %v375_v55 = vmul.f32 0.0078125, %v373_v54 }
 0x194   : > { %v372_v56 = vpop.xlane.xlu1 %371  ;;  %v364_v57 = vpop.xlane.xlu0 %363 }
 0x195   : > { %v377_v58 = vadd.f32 1e-05, %v375_v55  ;;  %v374_v59 = vadd.f32 %v372_v56, %v364_v57 }
 0x197   : > { %871 = vrsqrt.f32 %v377_v58  ;;  %v376_v60 = vmul.f32 0.0078125, %v374_v59 }
 0x199   : > { %v378_v61 = vadd.f32 1e-05, %v376_v60 }
 0x19b   : > { %873 = vrsqrt.f32 %v378_v61 }
 0x1a1   : > { %v872_v62 = vpop.eup %871 }
 0x1a2   : > { %v403_v1 = vmul.f32 %v872_v62, %v1225_v19  ;;  %v385_v2 = vmul.f32 %v872_v62, %v1223_v18 }
 0x1a4   : > { %v411_v5 = vmul.f32 %v707_v63, %v403_v1  ;;  %v393_v6 = vmul.f32 %v705_v0, %v385_v2 }
 0x1a5   : > { %v874_v7 = vpop.eup %873 }
 0x1a6   : > { %v404_v8 = vmul.f32 %v874_v7, %v1221_v17  ;;  %v419_v9 = vadd.f32 %v708_v3, %v411_v5  ;;  %v386_v10 = vmul.f32 %v874_v7, %v1219_v16  ;;  %v401_v11 = vadd.f32 %v706_v4, %v393_v6 }
 0x1a8   : > { %v412_v12 = vmul.f32 %v707_v63, %v404_v8  ;;  %753 = vmatprep.mubr.msk.f32.mxu1 %vm336_vm0, %v419_v9  ;;  %v394_v13 = vmul.f32 %v705_v0, %v386_v10  ;;  %772 = vmatprep.mubr.msk.f32.mxu0 %vm336_vm0, %v401_v11 }
 0x1aa   : > { %v420_v14 = vadd.f32 %v708_v3, %v412_v12  ;;  %v402_v15 = vadd.f32 %v706_v4, %v394_v13 }
 0x1ac   : > { %754 = vmatmul.mubr.msk.f32.vlgmr.msra.gmra.mrb[0].mxu1 %vm336_vm0, %v420_v14  ;;  %773 = vmatmul.mubr.msk.f32.vlgmr.msra.gmra.mrb[0].mxu0 %vm336_vm0, %v402_v15 }
 0x27f   : > { %v755_v17 = vpop.f32.mrb[0].mxu1  ;;  %v774_v16 = vpop.f32.mrb[0].mxu0 }
 0x280   : > { %v596_v18 = vadd.f32 %v774_v16, %v755_v17  ;;  %v509_v19 = vpop.f32.mrb[1].mxu1  ;;  %v590_v20 = vpop.f32.mrb[1].mxu0 }
 0x281   : > { %v591_v21 = vadd.f32 %v590_v20, %v509_v19 }
 0x282   : > { %600 = vst.msk [vmem:[%s329_s15 + $0x8] sm:$0xff] %vm336_vm0, %v596_v18 }
 0x283   : > { %599 = vst.msk [vmem:[%s329_s15] sm:$0xff] %vm336_vm0, %v591_v21 }
 0x284 PF: > { %s1299_s27 = smov %s1148_s24  ;;  %p18_p6 = scmp.ge.s32.totalorder %s1148_s24, 10  }
 0x285   : > { %s1300_s24 = smov %s991_s25  ;;  %s1301_s25 = smov %s995_s26 }
 0x286   : > { %s1302_s26 = smov %s1159_s14  ;;  %20 = sbr.rel (!%p18_p6) target bundleno = 4 (0x4), region = 97 }
 0x28d   :  { %623 = vsyncpa [#allocation3], 1 }
 0x28e   :  { %625 = vsyncpa [#allocation3 + $0x1], 1 }
 0x28f   :  { %626 = vsyncpa [#allocation5], 1 }

</bundles_post_ra>
